<compile_context>
chip_gen: v5e
topology: v5e:2x2
jax: 0.10.0
libtpu: 0.0.40
codegen_flags: <defaults>
</compile_context>

<pallas_src>
import functools

import jax
import jax.numpy as jnp
from jax.experimental import pallas as pl
from jax.experimental.pallas import tpu as pltpu


def _cmdaf_kernel(ir_ref, vi_ref, out_ir_ref, out_vi_ref, *, inv_hw):
    ir = ir_ref[...]                                   # (R, HW_pad), input dtype
    vi = vi_ref[...]

    sub = ir - vi                                      # (R, HW_pad)
    # Spatial mean per row; accumulate in f32, divide by the TRUE HW
    # (zero-padded lanes contribute 0 to the sum).
    gap = jnp.sum(sub.astype(jnp.float32), axis=-1, keepdims=True) * inv_hw
    s = jax.nn.sigmoid(gap).astype(sub.dtype)          # (R, 1)

    t = sub * s                                        # sub * sigmoid(gap)
    # out_vi = vi + sub*sigmoid(gap)
    # out_ir = ir + (vi-ir)*sigmoid(-gap) = ir + (t - sub)   [sigmoid(-x)=1-sigmoid(x)]
    out_vi_ref[...] = (vi + t).astype(out_vi_ref.dtype)
    out_ir_ref[...] = (ir + (t - sub)).astype(out_ir_ref.dtype)


def cmdaf(feature_ir: jax.Array, feature_vi: jax.Array,
          *, vmem_target_bytes: int = 40 * 1024 * 1024):
    """feature_ir, feature_vi: NCHW arrays of identical shape/dtype."""
    assert feature_ir.shape == feature_vi.shape
    assert feature_ir.dtype == feature_vi.dtype
    N, C, H, W = feature_ir.shape
    HW = H * W
    NC = N * C
    dtype = feature_ir.dtype
    itemsize = jnp.dtype(dtype).itemsize

    # Lane-dense last dim: pad HW up to a multiple of 128.
    HW_pad = ((HW + 127) // 128) * 128

    ir2 = feature_ir.reshape(NC, HW)
    vi2 = feature_vi.reshape(NC, HW)
    if HW_pad != HW:
        pad = ((0, 0), (0, HW_pad - HW))
        ir2 = jnp.pad(ir2, pad)
        vi2 = jnp.pad(vi2, pad)

    # Sublane packing for the row dim: 8 (f32), 16 (bf16), 32 (int8).
    pack = max(8, 32 // itemsize)

    # Size the row block so 4 arrays x 2 buffers x block fits the VMEM target.
    per_array_cap = vmem_target_bytes // 8
    r_cap = max(pack, (per_array_cap // (HW_pad * itemsize)) // pack * pack)
    nc_rounded = ((NC + pack - 1) // pack) * pack
    R = min(r_cap, nc_rounded)

    grid = (pl.cdiv(NC, R),)
    block = pl.BlockSpec((R, HW_pad), lambda i: (i, 0))

    block_bytes = R * HW_pad * itemsize
    vmem_limit = max(48 * 1024 * 1024, 8 * block_bytes + (1 << 20))

    kernel = functools.partial(_cmdaf_kernel, inv_hw=1.0 / HW)

    out_ir2, out_vi2 = pl.pallas_call(
        kernel,
        out_shape=(
            jax.ShapeDtypeStruct((NC, HW_pad), dtype),
            jax.ShapeDtypeStruct((NC, HW_pad), dtype),
        ),
        grid_spec=pltpu.PrefetchScalarGridSpec(
            num_scalar_prefetch=0,
            grid=grid,
            in_specs=[block, block],
            out_specs=[block, block],
        ),
        compiler_params=pltpu.CompilerParams(
            dimension_semantics=("parallel",),
            vmem_limit_bytes=vmem_limit,
        ),
    )(ir2, vi2)

    if HW_pad != HW:
        out_ir2 = out_ir2[:, :HW]
        out_vi2 = out_vi2[:, :HW]
    return out_ir2.reshape(N, C, H, W), out_vi2.reshape(N, C, H, W)


def _cmdaf_ref(ir, vi):
    sub = ir - vi
    gap_a = jnp.mean(sub, axis=(2, 3), keepdims=True)
    ir_vi_att = sub * jax.nn.sigmoid(gap_a)
    sub2 = vi - ir
    gap_b = jnp.mean(sub2, axis=(2, 3), keepdims=True)
    vi_ir_att = sub2 * jax.nn.sigmoid(gap_b)
    return ir + vi_ir_att, vi + ir_vi_att


if __name__ == "__main__":
    key = jax.random.PRNGKey(0)
    k_ir, k_vi = jax.random.split(key)
    N, C, H, W = 2, 4, 16, 16
    feature_ir = jax.random.normal(k_ir, (N, C, H, W), dtype=jnp.float32)
    feature_vi = jax.random.normal(k_vi, (N, C, H, W), dtype=jnp.float32)

    out_ir, out_vi = cmdaf(feature_ir, feature_vi)
    jax.block_until_ready((out_ir, out_vi))

    ref_ir, ref_vi = _cmdaf_ref(feature_ir, feature_vi)
    assert jnp.allclose(out_ir, ref_ir, atol=1e-5, rtol=1e-5)
    assert jnp.allclose(out_vi, ref_vi, atol=1e-5, rtol=1e-5)

    print("KERNEL_OK")
</pallas_src>

<mosaic_0001>
module attributes {stable_mosaic.version = 11 : i64} {
  func.func @_cmdaf_kernel(%arg0: i32, %arg1: memref<8x256xf32, #tpu.memory_space<vmem>>, %arg2: memref<8x256xf32, #tpu.memory_space<vmem>>, %arg3: memref<8x256xf32, #tpu.memory_space<vmem>>, %arg4: memref<8x256xf32, #tpu.memory_space<vmem>>) attributes {dimension_semantics = [#tpu.dimension_semantics<parallel>], iteration_bounds = array<i64: 1>, scalar_prefetch = 0 : i64, scratch_operands = 0 : i64, tpu.core_type = #tpu.core_type<tc>, window_params = [{transform_indices = @transform_0, window_bounds = array<i64: 8, 256>}, {transform_indices = @transform_1, window_bounds = array<i64: 8, 256>}, {transform_indices = @transform_2, window_bounds = array<i64: 8, 256>}, {transform_indices = @transform_3, window_bounds = array<i64: 8, 256>}]} {
    %c0 = arith.constant 0 : index
    %c0_0 = arith.constant 0 : index
    %0 = vector.load %arg1[%c0, %c0_0] : memref<8x256xf32, #tpu.memory_space<vmem>>, vector<8x256xf32>
    %c0_1 = arith.constant 0 : index
    %c0_2 = arith.constant 0 : index
    %1 = vector.load %arg2[%c0_1, %c0_2] : memref<8x256xf32, #tpu.memory_space<vmem>>, vector<8x256xf32>
    %2 = arith.subf %0, %1 : vector<8x256xf32>
    %cst = arith.constant dense<0.000000e+00> : vector<8xf32>
    %3 = vector.multi_reduction <add>, %2, %cst [1] : vector<8x256xf32> to vector<8xf32>
    %4 = vector.shape_cast %3 : vector<8xf32> to vector<8x1xf32>
    %cst_3 = arith.constant 3.906250e-03 : f32
    %5 = vector.broadcast %cst_3 : f32 to vector<8x1xf32>
    %6 = arith.mulf %4, %5 : vector<8x1xf32>
    %7 = arith.negf %6 : vector<8x1xf32>
    %8 = math.exp %7 : vector<8x1xf32>
    %cst_4 = arith.constant 1.000000e+00 : f32
    %9 = vector.broadcast %cst_4 : f32 to vector<8x1xf32>
    %10 = arith.addf %9, %8 : vector<8x1xf32>
    %11 = arith.divf %9, %10 : vector<8x1xf32>
    %12 = vector.broadcast %11 : vector<8x1xf32> to vector<8x256xf32>
    %13 = arith.mulf %2, %12 : vector<8x256xf32>
    %14 = arith.addf %1, %13 : vector<8x256xf32>
    %c0_5 = arith.constant 0 : index
    %c0_6 = arith.constant 0 : index
    %15 = vector.load %arg4[%c0_5, %c0_6] : memref<8x256xf32, #tpu.memory_space<vmem>>, vector<8x256xf32>
    tpu.vector_store %arg4[%c0_5, %c0_6], %14 {strides = array<i32>} : memref<8x256xf32, #tpu.memory_space<vmem>>, vector<8x256xf32>,
    %16 = arith.subf %13, %2 : vector<8x256xf32>
    %17 = arith.addf %0, %16 : vector<8x256xf32>
    %c0_7 = arith.constant 0 : index
    %c0_8 = arith.constant 0 : index
    %18 = vector.load %arg3[%c0_7, %c0_8] : memref<8x256xf32, #tpu.memory_space<vmem>>, vector<8x256xf32>
    tpu.vector_store %arg3[%c0_7, %c0_8], %17 {strides = array<i32>} : memref<8x256xf32, #tpu.memory_space<vmem>>, vector<8x256xf32>,
    return
  }
  func.func @transform_0(%arg0: i32) -> (i32, i32) {
    %c0_i32 = arith.constant 0 : i32
    %c0_i32_0 = arith.constant 0 : i32
    return %arg0, %c0_i32 : i32, i32
  }
  func.func @transform_1(%arg0: i32) -> (i32, i32) {
    %c0_i32 = arith.constant 0 : i32
    %c0_i32_0 = arith.constant 0 : i32
    return %arg0, %c0_i32 : i32, i32
  }
  func.func @transform_2(%arg0: i32) -> (i32, i32) {
    %c0_i32 = arith.constant 0 : i32
    %c0_i32_0 = arith.constant 0 : i32
    return %arg0, %c0_i32 : i32, i32
  }
  func.func @transform_3(%arg0: i32) -> (i32, i32) {
    %c0_i32 = arith.constant 0 : i32
    %c0_i32_0 = arith.constant 0 : i32
    return %arg0, %c0_i32 : i32, i32
  }
}

</mosaic_0001>

<bundles_post_ra>
// kernel: tpu_custom_call.1
= control target key start
LH: loop header
LB: loop body
LE: loop exit
PB: predicated region body
PF: predicated region fallthrough
CT: control target
= control target key end

     0   :  { %9 = vsyncpa [#allocation3], 0  ;;  %s267_s0 = inlined_call_operand.hbm [shape: f32[8,256], index: 0, kind: input, shape index: {}]   ;;  %s268_s1 = inlined_call_operand.hbm [shape: f32[8,256], index: 1, kind: input, shape index: {}]   ;;  %s269_s2 = inlined_call_operand.hbm [shape: f32[8,256], index: 2, kind: output, shape index: {0}]   ;;  %s270_s3 = inlined_call_operand.hbm [shape: f32[8,256], index: 3, kind: output, shape index: {1}]  }
   0x1   :  { %10 = vsyncpa [#allocation6], 0 }
   0x2   :  { %11 = vsyncpa [#allocation4], 0 }
   0x3   :  { %12 = vsyncpa [#allocation9], 0  ;;  %s18_s14 = sshll.u32 %s267_s0, 4  ;;  %s231_s15 = smov [#allocation2]   ;;  %s19_s14 = int_to_ptr.hbm [resolvable:$true] %s18_s14 }
   0x4   :  { %s20_s16 = sshll.u32 %s231_s15, 4  ;;  %s29_s19 = sshll.u32 %s268_s1, 4  ;;  %s21_s16 = int_to_ptr.vmem [resolvable:$true] %s20_s16  ;;  %s30_s19 = int_to_ptr.hbm [resolvable:$true] %s29_s19 }
   0x5   :  { %23 = dma.hbm_to_vmem [thread:$0]  %s19_s14, 256, %s21_s16, [#allocation3]  }
   0x6   :  { %s232_s20 = smov [#allocation5]  }
   0x7   :  { %s31_s21 = sshll.u32 %s232_s20, 4  ;;  %s32_s21 = int_to_ptr.vmem [resolvable:$true] %s31_s21 }
   0x8   :  { %34 = dma.hbm_to_vmem [thread:$0]  %s30_s19, 256, %s32_s21, [#allocation6]  }
   0x9   :  { %223 = dma.done.wait [#allocation3], 256  }
   0xa   :  { %224 = vsyncadd [#allocation3], 4294967040 }
   0xb   :  { %225 = dma.done.wait [#allocation6], 256  }
   0xc   :  { %226 = vsyncadd [#allocation6], 4294967040  ;;  %v43_v0 = vld [vmem:[#allocation2] sm:$0xff]  ;;  %v44_v1 = vld [vmem:[#allocation2 + $0x8] sm:$0xff]  ;;  %s233_s0 = smov [#allocation8]   ;;  %s102_s24 = sshll.u32 %s270_s3, 4  ;;  %s103_s24 = int_to_ptr.hbm [resolvable:$true] %s102_s24 }
   0xd   :  { %v45_v2 = vld [vmem:[#allocation5] sm:$0xff]  ;;  %v46_v3 = vld [vmem:[#allocation5 + $0x8] sm:$0xff]  ;;  %s100_s1 = sshll.u32 %s233_s0, 4  ;;  %s234_s25 = smov [#allocation7]   ;;  %s101_s1 = int_to_ptr.vmem [resolvable:$true] %s100_s1 }
   0xe   :  { %v47_v4 = vsub.f32 %v43_v0, %v45_v2  ;;  %v48_v5 = vsub.f32 %v44_v1, %v46_v3  ;;  %s89_s26 = sshll.u32 %s234_s25, 4  ;;  %s91_s29 = sshll.u32 %s269_s2, 4  ;;  %s90_s26 = int_to_ptr.vmem [resolvable:$true] %s89_s26  ;;  %s92_s29 = int_to_ptr.hbm [resolvable:$true] %s91_s29 }
  0x10   :  { %v49_v6 = vadd.f32 %v48_v5, %v47_v4 }
  0x12   :  { %50 = vadd.xlane.f32.xlu0 %v49_v6 }
  0x85   :  { %v51_v7 = vpop.xlane.xlu0 %50 }
  0x86   :  { %v118_v8 = vmul.f32 -0.00390625, %v51_v7 }
  0x88   :  { %v54_v9 = vmul.f32 1.442695, %v118_v8 }
  0x8a   :  { %123 = vpow2.f32 %v54_v9 }
  0x90   :  { %v124_v10 = vpop.eup %123 }
  0x91   :  { %v56_v11 = vadd.f32 1.0, %v124_v10 }
  0x93   :  { %125 = vrcp.f32 %v56_v11  ;;  %v68_v15 = vand.u32 2147483648, %v56_v11  ;;  %v66_v17 = vand.u32 2147483647, %v56_v11  ;;  %vm62_vm1 = vweird.f32 %v56_v11 }
  0x95   :  { %v69_v19 = vor.u32 1.1754944e-38, %v68_v15  ;;  %vm67_vm3 = vcmp.eq.f32.partialorder %v66_v17, 8.507059e+37 }
  0x99   :  { %v126_v12 = vpop.eup %125 }
  0x9a   :  { %v58_v13 = vmul.f32 %v126_v12, %v56_v11  ;;  %vm63_vm0 = vweird.f32 %v126_v12 }
  0x9b   :  { %vm64_vm2 = vmor %vm62_vm1, %vm63_vm0 }
  0x9c   :  { %v59_v14 = vsub.f32 1.0, %v58_v13 }
  0x9e   :  { %v60_v16 = vmul.f32 %v126_v12, %v59_v14 }
  0xa0   :  { %v61_v18 = vadd.f32 %v126_v12, %v60_v16 }
  0xa2   :  { %v65_v20 = vsel %vm64_vm2, %v126_v12, %v61_v18 }
  0xa3   :  { %v70_v21 = vsel %vm67_vm3, %v69_v19, %v65_v20 }
  0xa4   :  { %v72_v22 = vmul.f32 %v70_v21, %v47_v4  ;;  %v73_v23 = vmul.f32 %v70_v21, %v48_v5 }
  0xa6   :  { %v78_v24 = vsub.f32 %v72_v22, %v47_v4  ;;  %v79_v25 = vsub.f32 %v73_v23, %v48_v5  ;;  %v74_v26 = vadd.f32 %v72_v22, %v45_v2  ;;  %v75_v27 = vadd.f32 %v73_v23, %v46_v3 }
  0xa8   :  { %v80_v28 = vadd.f32 %v78_v24, %v43_v0  ;;  %v81_v29 = vadd.f32 %v79_v25, %v44_v1  ;;  %76 = vst [vmem:[#allocation8] sm:$0xff] %v74_v26 }
  0xa9   :  { %77 = vst [vmem:[#allocation8 + $0x8] sm:$0xff] %v75_v27 }
  0xaa   :  { %82 = vst [vmem:[#allocation7] sm:$0xff] %v80_v28  ;;  %105 = dma.vmem_to_hbm [thread:$0]  %s101_s1, 256, %s103_s24, [#allocation9]  }
  0xab   :  { %83 = vst [vmem:[#allocation7 + $0x8] sm:$0xff] %v81_v29 }
  0xac   :  { %94 = dma.vmem_to_hbm [thread:$0]  %s90_s26, 256, %s92_s29, [#allocation4]  }
  0xad   :  { %227 = dma.done.wait [#allocation4], 256  }
  0xae   :  { %228 = vsyncadd [#allocation4], 4294967040 }
  0xaf   :  { %229 = dma.done.wait [#allocation9], 256  }
  0xb0   :  { %230 = vsyncadd [#allocation9], 4294967040 }
  0xb1   :  { %114 = vsyncpa [#allocation3], 1 }
  0xb2   :  { %115 = vsyncpa [#allocation6], 1 }
  0xb3   :  { %116 = vsyncpa [#allocation4], 1 }
  0xb4   :  { %117 = vsyncpa [#allocation9], 1 }

</bundles_post_ra>
